<compile_context>
chip_gen: v7x
topology: tpu7x:2x2x1
jax: 0.10.0
libtpu: 0.0.40
codegen_flags: <defaults>
</compile_context>

<pallas_src>
import jax
import jax.numpy as jnp
from jax.experimental import pallas as pl
from jax.experimental.pallas import tpu as pltpu


def _make_decoder_kernel(T, B, H):
    """Builds the kernel with static T/B/H closed over.

    Kernel refs:
      x_proj_ref : (T*B, 4H) f32  precomputed x_t @ W_ih^T + (b_ih + b_hh),
                                  time-major (rows [t*B, (t+1)*B) are step t)
      w_hh_t_ref : (H, 4H)   f32  W_hh^T (pre-transposed; gate order i,f,g,o)
      w_out_t_ref: (H, Pp)   f32  W_out^T zero-padded to lane-dense Pp
      b_out_ref  : (1, Pp)   f32  zero-padded bias
      out_ref    : (T*B, Pp) f32  time-major, lane-dense output slab
      hseq_scr   : (T*B, H)  f32  VMEM scratch holding all hidden states
    """

    def kernel(x_proj_ref, w_hh_t_ref, w_out_t_ref, b_out_ref, out_ref,
               hseq_scr):
        # Hoisted once: recurrent weight stays resident for the whole loop.
        w_hh_t = w_hh_t_ref[...]                               # (H, 4H)

        h = jnp.zeros((B, H), jnp.float32)
        c = jnp.zeros((B, H), jnp.float32)

        # Static loop (T is small); h/c are value carries, one MXU push/step.
        # TODO(synk): for small T the hseq_scr round trip could be skipped by
        # stacking the carried h_t values in-kernel (review item 7); the VMEM
        # scratch store path is kept because it is proven to lower cleanly and
        # the stores are off the serial per-step dependence chain.
        for t in range(T):
            x_t = x_proj_ref[t * B:(t + 1) * B, :]             # (B, 4H) static
            gates = x_t + jnp.dot(h, w_hh_t,
                                  preferred_element_type=jnp.float32)
            # TODO(synk): gate slices at 32-lane offsets cost a few XLU ops per
            # step (review item 6); accepted — XLU is a separate VLIW slot.
            i = jax.nn.sigmoid(gates[:, 0 * H:1 * H])
            f = jax.nn.sigmoid(gates[:, 1 * H:2 * H])
            g = jnp.tanh(gates[:, 2 * H:3 * H])
            o = jax.nn.sigmoid(gates[:, 3 * H:4 * H])
            c = f * c + i * g
            h = o * jnp.tanh(c)
            hseq_scr[t * B:(t + 1) * B, :] = h                 # static store

        # Deferred head: ONE flattened (T*B, H) @ (H, Pp) matmul, written as a
        # fully lane-dense (T*B, Pp) slab (no masked partial stores).
        h_all = hseq_scr[...]                                  # (T*B, H)
        out_ref[...] = (jnp.dot(h_all, w_out_t_ref[...],
                                preferred_element_type=jnp.float32)
                        + b_out_ref[...])

    return kernel


def decoder_forward(features, poses, params):
    """features: (B, E) f32;  poses: (B, T) int32 in [0, P).  Returns (B, T, P)."""
    emb = params["embedding"]                     # (P, E)
    w_ih = params["w_ih"]                         # (4H, E)
    w_hh = params["w_hh"]                         # (4H, H)
    b = params["b_ih"] + params["b_hh"]           # (4H,)
    w_out = params["w_out"]                       # (P, H)
    b_out = params["b_out"]                       # (P,)

    B, E = features.shape
    T = poses.shape[1]
    H = w_hh.shape[1]
    P = w_out.shape[0]
    Pp = ((P + 127) // 128) * 128                 # lane-dense padded head width

    # Glue (wrapper XLA): embedding gather + time-major inputs (x[0]=features).
    poses_embed = jnp.take(emb, poses, axis=0)                  # (B, T, E)
    x_seq = jnp.concatenate(
        [features[None, :, :],
         jnp.transpose(poses_embed, (1, 0, 2))[1:]], axis=0)    # (T, B, E)

    # Hoisted batched input projection (no sequential dependence): one big
    # matmul for all T steps, bias folded, flattened time-major.
    x_proj = (jnp.einsum("tbe,fe->tbf", x_seq, w_ih) + b
              ).reshape(T * B, 4 * H)                           # (T*B, 4H)

    # Lane-dense (zero-padded) output head; sliced back to P after the call.
    w_out_t_pad = jnp.zeros((H, Pp), jnp.float32).at[:, :P].set(w_out.T)
    b_out_pad = jnp.zeros((1, Pp), jnp.float32).at[:, :P].set(b_out)

    cost = pl.CostEstimate(
        flops=2 * T * B * H * (4 * H) + 2 * T * B * H * Pp,
        transcendentals=5 * T * B * H,
        bytes_accessed=4 * (T * B * 4 * H + H * 4 * H + H * Pp + Pp
                            + T * B * Pp),
    )

    out_flat = pl.pallas_call(
        _make_decoder_kernel(T, B, H),
        out_shape=jax.ShapeDtypeStruct((T * B, Pp), jnp.float32),
        in_specs=[
            pl.BlockSpec(memory_space=pltpu.MemorySpace.VMEM),  # X_proj
            pl.BlockSpec(memory_space=pltpu.MemorySpace.VMEM),  # W_hh^T
            pl.BlockSpec(memory_space=pltpu.MemorySpace.VMEM),  # W_out^T (pad)
            pl.BlockSpec(memory_space=pltpu.MemorySpace.VMEM),  # b_out (pad)
        ],
        out_specs=pl.BlockSpec(memory_space=pltpu.MemorySpace.VMEM),
        scratch_shapes=[pltpu.VMEM((T * B, H), jnp.float32)],
        compiler_params=pltpu.CompilerParams(
            vmem_limit_bytes=4 * 1024 * 1024),   # right-sized (review item 5)
        cost_estimate=cost,
    )(x_proj, w_hh.T, w_out_t_pad, b_out_pad)

    # Cheap wrapper-side transpose back to batch-major + slice off the padding.
    return out_flat.reshape(T, B, Pp).transpose(1, 0, 2)[..., :P]   # (B, T, P)


def decoder_reference(features, poses, params):
    """Pure-JAX reference of the PyTorch forward, for validation."""
    emb = params["embedding"]
    w_ih, w_hh = params["w_ih"], params["w_hh"]
    b = params["b_ih"] + params["b_hh"]
    w_out, b_out = params["w_out"], params["b_out"]
    B, _ = features.shape
    T = poses.shape[1]
    H = w_hh.shape[1]

    poses_embed = jnp.take(emb, poses, axis=0)
    h = jnp.zeros((B, H), jnp.float32)
    c = jnp.zeros((B, H), jnp.float32)
    outs = []
    for t in range(T):
        x = features if t == 0 else poses_embed[:, t, :]
        gates = x @ w_ih.T + h @ w_hh.T + b
        i = jax.nn.sigmoid(gates[:, 0 * H:1 * H])
        f = jax.nn.sigmoid(gates[:, 1 * H:2 * H])
        g = jnp.tanh(gates[:, 2 * H:3 * H])
        o = jax.nn.sigmoid(gates[:, 3 * H:4 * H])
        c = f * c + i * g
        h = o * jnp.tanh(c)
        outs.append(h @ w_out.T + b_out)
    return jnp.stack(outs, axis=1)


def init_params(key, embedding_size, hidden_size, poses_size):
    """Deterministic init matching the PyTorch module's parameter shapes."""
    ks = jax.random.split(key, 7)
    H, E, P = hidden_size, embedding_size, poses_size
    s = 1.0 / jnp.sqrt(H)
    return {
        "w_ih": jax.random.uniform(ks[0], (4 * H, E), jnp.float32, -s, s),
        "w_hh": jax.random.uniform(ks[1], (4 * H, H), jnp.float32, -s, s),
        "b_ih": jax.random.uniform(ks[2], (4 * H,), jnp.float32, -s, s),
        "b_hh": jax.random.uniform(ks[3], (4 * H,), jnp.float32, -s, s),
        "w_out": jax.random.uniform(ks[4], (P, H), jnp.float32, -s, s),
        "b_out": jax.random.uniform(ks[5], (P,), jnp.float32, -s, s),
        "embedding": jax.random.normal(ks[6], (P, E), jnp.float32),
    }


if __name__ == "__main__":
    B, E, H, P, T = 2, 16, 32, 24, 8

    key = jax.random.PRNGKey(0)
    k_feat, k_pose, k_par = jax.random.split(key, 3)

    params = init_params(k_par, E, H, P)
    features = jax.random.normal(k_feat, (B, E), jnp.float32)
    poses = jax.random.randint(k_pose, (B, T), 0, P, dtype=jnp.int32)

    out = jax.block_until_ready(decoder_forward(features, poses, params))
    ref = decoder_reference(features, poses, params)

    assert out.shape == (B, T, P), out.shape
    assert jnp.allclose(out, ref, atol=1e-5, rtol=1e-5), (
        float(jnp.max(jnp.abs(out - ref))))
    print("KERNEL_OK")
</pallas_src>

<mosaic_0001>
module attributes {stable_mosaic.version = 11 : i64} {
  func.func @kernel(%arg0: memref<16x128xf32, #tpu.memory_space<vmem>>, %arg1: memref<32x128xf32, #tpu.memory_space<vmem>>, %arg2: memref<32x128xf32, #tpu.memory_space<vmem>>, %arg3: memref<1x128xf32, #tpu.memory_space<vmem>>, %arg4: memref<16x128xf32, #tpu.memory_space<vmem>>, %arg5: memref<16x32xf32, #tpu.memory_space<vmem>>) attributes {dimension_semantics = [], scalar_prefetch = 0 : i64, scratch_operands = 1 : i64, tpu.core_type = #tpu.core_type<tc>} {
    %c0 = arith.constant 0 : index
    %c0_0 = arith.constant 0 : index
    %0 = vector.load %arg1[%c0, %c0_0] : memref<32x128xf32, #tpu.memory_space<vmem>>, vector<32x128xf32>
    %cst = arith.constant 0.000000e+00 : f32
    %1 = vector.broadcast %cst : f32 to vector<2x32xf32>
    %cst_1 = arith.constant 0.000000e+00 : f32
    %2 = vector.broadcast %cst_1 : f32 to vector<2x32xf32>
    %c0_2 = arith.constant 0 : index
    %c0_3 = arith.constant 0 : index
    %3 = vector.load %arg0[%c0_2, %c0_3] : memref<16x128xf32, #tpu.memory_space<vmem>>, vector<2x128xf32>
    %cst_4 = arith.constant dense<0.000000e+00> : vector<2x128xf32>
    %4 = tpu.matmul %1, %0, %cst_4 {dimension_numbers = #tpu.dot_dimension_numbers<[1], [0], [0], [1], [0, 0, 1, 1], [], []>} : vector<2x32xf32>, vector<32x128xf32>, vector<2x128xf32> -> vector<2x128xf32>
    %5 = arith.addf %3, %4 : vector<2x128xf32>
    %6 = vector.extract_strided_slice %5 {offsets = [0, 0], sizes = [2, 32], strides = [1, 1]} : vector<2x128xf32> to vector<2x32xf32>
    %7 = arith.negf %6 : vector<2x32xf32>
    %8 = math.exp %7 : vector<2x32xf32>
    %cst_5 = arith.constant 1.000000e+00 : f32
    %9 = vector.broadcast %cst_5 : f32 to vector<2x32xf32>
    %10 = arith.addf %9, %8 : vector<2x32xf32>
    %11 = arith.divf %9, %10 : vector<2x32xf32>
    %12 = vector.extract_strided_slice %5 {offsets = [0, 32], sizes = [2, 32], strides = [1, 1]} : vector<2x128xf32> to vector<2x32xf32>
    %13 = arith.negf %12 : vector<2x32xf32>
    %14 = math.exp %13 : vector<2x32xf32>
    %cst_6 = arith.constant 1.000000e+00 : f32
    %15 = vector.broadcast %cst_6 : f32 to vector<2x32xf32>
    %16 = arith.addf %15, %14 : vector<2x32xf32>
    %17 = arith.divf %15, %16 : vector<2x32xf32>
    %18 = vector.extract_strided_slice %5 {offsets = [0, 64], sizes = [2, 32], strides = [1, 1]} : vector<2x128xf32> to vector<2x32xf32>
    %19 = math.tanh %18 : vector<2x32xf32>
    %20 = vector.extract_strided_slice %5 {offsets = [0, 96], sizes = [2, 32], strides = [1, 1]} : vector<2x128xf32> to vector<2x32xf32>
    %21 = arith.negf %20 : vector<2x32xf32>
    %22 = math.exp %21 : vector<2x32xf32>
    %cst_7 = arith.constant 1.000000e+00 : f32
    %23 = vector.broadcast %cst_7 : f32 to vector<2x32xf32>
    %24 = arith.addf %23, %22 : vector<2x32xf32>
    %25 = arith.divf %23, %24 : vector<2x32xf32>
    %26 = arith.mulf %17, %2 : vector<2x32xf32>
    %27 = arith.mulf %11, %19 : vector<2x32xf32>
    %28 = arith.addf %26, %27 : vector<2x32xf32>
    %29 = math.tanh %28 : vector<2x32xf32>
    %30 = arith.mulf %25, %29 : vector<2x32xf32>
    %c0_8 = arith.constant 0 : index
    %c0_9 = arith.constant 0 : index
    %31 = vector.load %arg5[%c0_8, %c0_9] : memref<16x32xf32, #tpu.memory_space<vmem>>, vector<2x32xf32>
    tpu.vector_store %arg5[%c0_8, %c0_9], %30 {strides = array<i32>} : memref<16x32xf32, #tpu.memory_space<vmem>>, vector<2x32xf32>,
    %c2 = arith.constant 2 : index
    %c0_10 = arith.constant 0 : index
    %32 = vector.load %arg0[%c2, %c0_10] : memref<16x128xf32, #tpu.memory_space<vmem>>, vector<2x128xf32>
    %cst_11 = arith.constant dense<0.000000e+00> : vector<2x128xf32>
    %33 = tpu.matmul %30, %0, %cst_11 {dimension_numbers = #tpu.dot_dimension_numbers<[1], [0], [0], [1], [0, 0, 1, 1], [], []>} : vector<2x32xf32>, vector<32x128xf32>, vector<2x128xf32> -> vector<2x128xf32>
    %34 = arith.addf %32, %33 : vector<2x128xf32>
    %35 = vector.extract_strided_slice %34 {offsets = [0, 0], sizes = [2, 32], strides = [1, 1]} : vector<2x128xf32> to vector<2x32xf32>
    %36 = arith.negf %35 : vector<2x32xf32>
    %37 = math.exp %36 : vector<2x32xf32>
    %cst_12 = arith.constant 1.000000e+00 : f32
    %38 = vector.broadcast %cst_12 : f32 to vector<2x32xf32>
    %39 = arith.addf %38, %37 : vector<2x32xf32>
    %40 = arith.divf %38, %39 : vector<2x32xf32>
    %41 = vector.extract_strided_slice %34 {offsets = [0, 32], sizes = [2, 32], strides = [1, 1]} : vector<2x128xf32> to vector<2x32xf32>
    %42 = arith.negf %41 : vector<2x32xf32>
    %43 = math.exp %42 : vector<2x32xf32>
    %cst_13 = arith.constant 1.000000e+00 : f32
    %44 = vector.broadcast %cst_13 : f32 to vector<2x32xf32>
    %45 = arith.addf %44, %43 : vector<2x32xf32>
    %46 = arith.divf %44, %45 : vector<2x32xf32>
    %47 = vector.extract_strided_slice %34 {offsets = [0, 64], sizes = [2, 32], strides = [1, 1]} : vector<2x128xf32> to vector<2x32xf32>
    %48 = math.tanh %47 : vector<2x32xf32>
    %49 = vector.extract_strided_slice %34 {offsets = [0, 96], sizes = [2, 32], strides = [1, 1]} : vector<2x128xf32> to vector<2x32xf32>
    %50 = arith.negf %49 : vector<2x32xf32>
    %51 = math.exp %50 : vector<2x32xf32>
    %cst_14 = arith.constant 1.000000e+00 : f32
    %52 = vector.broadcast %cst_14 : f32 to vector<2x32xf32>
    %53 = arith.addf %52, %51 : vector<2x32xf32>
    %54 = arith.divf %52, %53 : vector<2x32xf32>
    %55 = arith.mulf %46, %28 : vector<2x32xf32>
    %56 = arith.mulf %40, %48 : vector<2x32xf32>
    %57 = arith.addf %55, %56 : vector<2x32xf32>
    %58 = math.tanh %57 : vector<2x32xf32>
    %59 = arith.mulf %54, %58 : vector<2x32xf32>
    %c2_15 = arith.constant 2 : index
    %c0_16 = arith.constant 0 : index
    %60 = vector.load %arg5[%c2_15, %c0_16] : memref<16x32xf32, #tpu.memory_space<vmem>>, vector<2x32xf32>
    tpu.vector_store %arg5[%c2_15, %c0_16], %59 {strides = array<i32>} : memref<16x32xf32, #tpu.memory_space<vmem>>, vector<2x32xf32>,
    %c4 = arith.constant 4 : index
    %c0_17 = arith.constant 0 : index
    %61 = vector.load %arg0[%c4, %c0_17] : memref<16x128xf32, #tpu.memory_space<vmem>>, vector<2x128xf32>
    %cst_18 = arith.constant dense<0.000000e+00> : vector<2x128xf32>
    %62 = tpu.matmul %59, %0, %cst_18 {dimension_numbers = #tpu.dot_dimension_numbers<[1], [0], [0], [1], [0, 0, 1, 1], [], []>} : vector<2x32xf32>, vector<32x128xf32>, vector<2x128xf32> -> vector<2x128xf32>
    %63 = arith.addf %61, %62 : vector<2x128xf32>
    %64 = vector.extract_strided_slice %63 {offsets = [0, 0], sizes = [2, 32], strides = [1, 1]} : vector<2x128xf32> to vector<2x32xf32>
    %65 = arith.negf %64 : vector<2x32xf32>
    %66 = math.exp %65 : vector<2x32xf32>
    %cst_19 = arith.constant 1.000000e+00 : f32
    %67 = vector.broadcast %cst_19 : f32 to vector<2x32xf32>
    %68 = arith.addf %67, %66 : vector<2x32xf32>
    %69 = arith.divf %67, %68 : vector<2x32xf32>
    %70 = vector.extract_strided_slice %63 {offsets = [0, 32], sizes = [2, 32], strides = [1, 1]} : vector<2x128xf32> to vector<2x32xf32>
    %71 = arith.negf %70 : vector<2x32xf32>
    %72 = math.exp %71 : vector<2x32xf32>
    %cst_20 = arith.constant 1.000000e+00 : f32
    %73 = vector.broadcast %cst_20 : f32 to vector<2x32xf32>
    %74 = arith.addf %73, %72 : vector<2x32xf32>
    %75 = arith.divf %73, %74 : vector<2x32xf32>
    %76 = vector.extract_strided_slice %63 {offsets = [0, 64], sizes = [2, 32], strides = [1, 1]} : vector<2x128xf32> to vector<2x32xf32>
    %77 = math.tanh %76 : vector<2x32xf32>
    %78 = vector.extract_strided_slice %63 {offsets = [0, 96], sizes = [2, 32], strides = [1, 1]} : vector<2x128xf32> to vector<2x32xf32>
    %79 = arith.negf %78 : vector<2x32xf32>
    %80 = math.exp %79 : vector<2x32xf32>
    %cst_21 = arith.constant 1.000000e+00 : f32
    %81 = vector.broadcast %cst_21 : f32 to vector<2x32xf32>
    %82 = arith.addf %81, %80 : vector<2x32xf32>
    %83 = arith.divf %81, %82 : vector<2x32xf32>
    %84 = arith.mulf %75, %57 : vector<2x32xf32>
    %85 = arith.mulf %69, %77 : vector<2x32xf32>
    %86 = arith.addf %84, %85 : vector<2x32xf32>
    %87 = math.tanh %86 : vector<2x32xf32>
    %88 = arith.mulf %83, %87 : vector<2x32xf32>
    %c4_22 = arith.constant 4 : index
    %c0_23 = arith.constant 0 : index
    %89 = vector.load %arg5[%c4_22, %c0_23] : memref<16x32xf32, #tpu.memory_space<vmem>>, vector<2x32xf32>
    tpu.vector_store %arg5[%c4_22, %c0_23], %88 {strides = array<i32>} : memref<16x32xf32, #tpu.memory_space<vmem>>, vector<2x32xf32>,
    %c6 = arith.constant 6 : index
    %c0_24 = arith.constant 0 : index
    %90 = vector.load %arg0[%c6, %c0_24] : memref<16x128xf32, #tpu.memory_space<vmem>>, vector<2x128xf32>
    %cst_25 = arith.constant dense<0.000000e+00> : vector<2x128xf32>
    %91 = tpu.matmul %88, %0, %cst_25 {dimension_numbers = #tpu.dot_dimension_numbers<[1], [0], [0], [1], [0, 0, 1, 1], [], []>} : vector<2x32xf32>, vector<32x128xf32>, vector<2x128xf32> -> vector<2x128xf32>
    %92 = arith.addf %90, %91 : vector<2x128xf32>
    %93 = vector.extract_strided_slice %92 {offsets = [0, 0], sizes = [2, 32], strides = [1, 1]} : vector<2x128xf32> to vector<2x32xf32>
    %94 = arith.negf %93 : vector<2x32xf32>
    %95 = math.exp %94 : vector<2x32xf32>
    %cst_26 = arith.constant 1.000000e+00 : f32
    %96 = vector.broadcast %cst_26 : f32 to vector<2x32xf32>
    %97 = arith.addf %96, %95 : vector<2x32xf32>
    %98 = arith.divf %96, %97 : vector<2x32xf32>
    %99 = vector.extract_strided_slice %92 {offsets = [0, 32], sizes = [2, 32], strides = [1, 1]} : vector<2x128xf32> to vector<2x32xf32>
    %100 = arith.negf %99 : vector<2x32xf32>
    %101 = math.exp %100 : vector<2x32xf32>
    %cst_27 = arith.constant 1.000000e+00 : f32
    %102 = vector.broadcast %cst_27 : f32 to vector<2x32xf32>
    %103 = arith.addf %102, %101 : vector<2x32xf32>
    %104 = arith.divf %102, %103 : vector<2x32xf32>
    %105 = vector.extract_strided_slice %92 {offsets = [0, 64], sizes = [2, 32], strides = [1, 1]} : vector<2x128xf32> to vector<2x32xf32>
    %106 = math.tanh %105 : vector<2x32xf32>
    %107 = vector.extract_strided_slice %92 {offsets = [0, 96], sizes = [2, 32], strides = [1, 1]} : vector<2x128xf32> to vector<2x32xf32>
    %108 = arith.negf %107 : vector<2x32xf32>
    %109 = math.exp %108 : vector<2x32xf32>
    %cst_28 = arith.constant 1.000000e+00 : f32
    %110 = vector.broadcast %cst_28 : f32 to vector<2x32xf32>
    %111 = arith.addf %110, %109 : vector<2x32xf32>
    %112 = arith.divf %110, %111 : vector<2x32xf32>
    %113 = arith.mulf %104, %86 : vector<2x32xf32>
    %114 = arith.mulf %98, %106 : vector<2x32xf32>
    %115 = arith.addf %113, %114 : vector<2x32xf32>
    %116 = math.tanh %115 : vector<2x32xf32>
    %117 = arith.mulf %112, %116 : vector<2x32xf32>
    %c6_29 = arith.constant 6 : index
    %c0_30 = arith.constant 0 : index
    %118 = vector.load %arg5[%c6_29, %c0_30] : memref<16x32xf32, #tpu.memory_space<vmem>>, vector<2x32xf32>
    tpu.vector_store %arg5[%c6_29, %c0_30], %117 {strides = array<i32>} : memref<16x32xf32, #tpu.memory_space<vmem>>, vector<2x32xf32>,
    %c8 = arith.constant 8 : index
    %c0_31 = arith.constant 0 : index
    %119 = vector.load %arg0[%c8, %c0_31] : memref<16x128xf32, #tpu.memory_space<vmem>>, vector<2x128xf32>
    %cst_32 = arith.constant dense<0.000000e+00> : vector<2x128xf32>
    %120 = tpu.matmul %117, %0, %cst_32 {dimension_numbers = #tpu.dot_dimension_numbers<[1], [0], [0], [1], [0, 0, 1, 1], [], []>} : vector<2x32xf32>, vector<32x128xf32>, vector<2x128xf32> -> vector<2x128xf32>
    %121 = arith.addf %119, %120 : vector<2x128xf32>
    %122 = vector.extract_strided_slice %121 {offsets = [0, 0], sizes = [2, 32], strides = [1, 1]} : vector<2x128xf32> to vector<2x32xf32>
    %123 = arith.negf %122 : vector<2x32xf32>
    %124 = math.exp %123 : vector<2x32xf32>
    %cst_33 = arith.constant 1.000000e+00 : f32
    %125 = vector.broadcast %cst_33 : f32 to vector<2x32xf32>
    %126 = arith.addf %125, %124 : vector<2x32xf32>
    %127 = arith.divf %125, %126 : vector<2x32xf32>
    %128 = vector.extract_strided_slice %121 {offsets = [0, 32], sizes = [2, 32], strides = [1, 1]} : vector<2x128xf32> to vector<2x32xf32>
    %129 = arith.negf %128 : vector<2x32xf32>
    %130 = math.exp %129 : vector<2x32xf32>
    %cst_34 = arith.constant 1.000000e+00 : f32
    %131 = vector.broadcast %cst_34 : f32 to vector<2x32xf32>
    %132 = arith.addf %131, %130 : vector<2x32xf32>
    %133 = arith.divf %131, %132 : vector<2x32xf32>
    %134 = vector.extract_strided_slice %121 {offsets = [0, 64], sizes = [2, 32], strides = [1, 1]} : vector<2x128xf32> to vector<2x32xf32>
    %135 = math.tanh %134 : vector<2x32xf32>
    %136 = vector.extract_strided_slice %121 {offsets = [0, 96], sizes = [2, 32], strides = [1, 1]} : vector<2x128xf32> to vector<2x32xf32>
    %137 = arith.negf %136 : vector<2x32xf32>
    %138 = math.exp %137 : vector<2x32xf32>
    %cst_35 = arith.constant 1.000000e+00 : f32
    %139 = vector.broadcast %cst_35 : f32 to vector<2x32xf32>
    %140 = arith.addf %139, %138 : vector<2x32xf32>
    %141 = arith.divf %139, %140 : vector<2x32xf32>
    %142 = arith.mulf %133, %115 : vector<2x32xf32>
    %143 = arith.mulf %127, %135 : vector<2x32xf32>
    %144 = arith.addf %142, %143 : vector<2x32xf32>
    %145 = math.tanh %144 : vector<2x32xf32>
    %146 = arith.mulf %141, %145 : vector<2x32xf32>
    %c8_36 = arith.constant 8 : index
    %c0_37 = arith.constant 0 : index
    %147 = vector.load %arg5[%c8_36, %c0_37] : memref<16x32xf32, #tpu.memory_space<vmem>>, vector<2x32xf32>
    tpu.vector_store %arg5[%c8_36, %c0_37], %146 {strides = array<i32>} : memref<16x32xf32, #tpu.memory_space<vmem>>, vector<2x32xf32>,
    %c10 = arith.constant 10 : index
    %c0_38 = arith.constant 0 : index
    %148 = vector.load %arg0[%c10, %c0_38] : memref<16x128xf32, #tpu.memory_space<vmem>>, vector<2x128xf32>
    %cst_39 = arith.constant dense<0.000000e+00> : vector<2x128xf32>
    %149 = tpu.matmul %146, %0, %cst_39 {dimension_numbers = #tpu.dot_dimension_numbers<[1], [0], [0], [1], [0, 0, 1, 1], [], []>} : vector<2x32xf32>, vector<32x128xf32>, vector<2x128xf32> -> vector<2x128xf32>
    %150 = arith.addf %148, %149 : vector<2x128xf32>
    %151 = vector.extract_strided_slice %150 {offsets = [0, 0], sizes = [2, 32], strides = [1, 1]} : vector<2x128xf32> to vector<2x32xf32>
    %152 = arith.negf %151 : vector<2x32xf32>
    %153 = math.exp %152 : vector<2x32xf32>
    %cst_40 = arith.constant 1.000000e+00 : f32
    %154 = vector.broadcast %cst_40 : f32 to vector<2x32xf32>
    %155 = arith.addf %154, %153 : vector<2x32xf32>
    %156 = arith.divf %154, %155 : vector<2x32xf32>
    %157 = vector.extract_strided_slice %150 {offsets = [0, 32], sizes = [2, 32], strides = [1, 1]} : vector<2x128xf32> to vector<2x32xf32>
    %158 = arith.negf %157 : vector<2x32xf32>
    %159 = math.exp %158 : vector<2x32xf32>
    %cst_41 = arith.constant 1.000000e+00 : f32
    %160 = vector.broadcast %cst_41 : f32 to vector<2x32xf32>
    %161 = arith.addf %160, %159 : vector<2x32xf32>
    %162 = arith.divf %160, %161 : vector<2x32xf32>
    %163 = vector.extract_strided_slice %150 {offsets = [0, 64], sizes = [2, 32], strides = [1, 1]} : vector<2x128xf32> to vector<2x32xf32>
    %164 = math.tanh %163 : vector<2x32xf32>
    %165 = vector.extract_strided_slice %150 {offsets = [0, 96], sizes = [2, 32], strides = [1, 1]} : vector<2x128xf32> to vector<2x32xf32>
    %166 = arith.negf %165 : vector<2x32xf32>
    %167 = math.exp %166 : vector<2x32xf32>
    %cst_42 = arith.constant 1.000000e+00 : f32
    %168 = vector.broadcast %cst_42 : f32 to vector<2x32xf32>
    %169 = arith.addf %168, %167 : vector<2x32xf32>
    %170 = arith.divf %168, %169 : vector<2x32xf32>
    %171 = arith.mulf %162, %144 : vector<2x32xf32>
    %172 = arith.mulf %156, %164 : vector<2x32xf32>
    %173 = arith.addf %171, %172 : vector<2x32xf32>
    %174 = math.tanh %173 : vector<2x32xf32>
    %175 = arith.mulf %170, %174 : vector<2x32xf32>
    %c10_43 = arith.constant 10 : index
    %c0_44 = arith.constant 0 : index
    %176 = vector.load %arg5[%c10_43, %c0_44] : memref<16x32xf32, #tpu.memory_space<vmem>>, vector<2x32xf32>
    tpu.vector_store %arg5[%c10_43, %c0_44], %175 {strides = array<i32>} : memref<16x32xf32, #tpu.memory_space<vmem>>, vector<2x32xf32>,
    %c12 = arith.constant 12 : index
    %c0_45 = arith.constant 0 : index
    %177 = vector.load %arg0[%c12, %c0_45] : memref<16x128xf32, #tpu.memory_space<vmem>>, vector<2x128xf32>
    %cst_46 = arith.constant dense<0.000000e+00> : vector<2x128xf32>
    %178 = tpu.matmul %175, %0, %cst_46 {dimension_numbers = #tpu.dot_dimension_numbers<[1], [0], [0], [1], [0, 0, 1, 1], [], []>} : vector<2x32xf32>, vector<32x128xf32>, vector<2x128xf32> -> vector<2x128xf32>
    %179 = arith.addf %177, %178 : vector<2x128xf32>
    %180 = vector.extract_strided_slice %179 {offsets = [0, 0], sizes = [2, 32], strides = [1, 1]} : vector<2x128xf32> to vector<2x32xf32>
    %181 = arith.negf %180 : vector<2x32xf32>
    %182 = math.exp %181 : vector<2x32xf32>
    %cst_47 = arith.constant 1.000000e+00 : f32
    %183 = vector.broadcast %cst_47 : f32 to vector<2x32xf32>
    %184 = arith.addf %183, %182 : vector<2x32xf32>
    %185 = arith.divf %183, %184 : vector<2x32xf32>
    %186 = vector.extract_strided_slice %179 {offsets = [0, 32], sizes = [2, 32], strides = [1, 1]} : vector<2x128xf32> to vector<2x32xf32>
    %187 = arith.negf %186 : vector<2x32xf32>
    %188 = math.exp %187 : vector<2x32xf32>
    %cst_48 = arith.constant 1.000000e+00 : f32
    %189 = vector.broadcast %cst_48 : f32 to vector<2x32xf32>
    %190 = arith.addf %189, %188 : vector<2x32xf32>
    %191 = arith.divf %189, %190 : vector<2x32xf32>
    %192 = vector.extract_strided_slice %179 {offsets = [0, 64], sizes = [2, 32], strides = [1, 1]} : vector<2x128xf32> to vector<2x32xf32>
    %193 = math.tanh %192 : vector<2x32xf32>
    %194 = vector.extract_strided_slice %179 {offsets = [0, 96], sizes = [2, 32], strides = [1, 1]} : vector<2x128xf32> to vector<2x32xf32>
    %195 = arith.negf %194 : vector<2x32xf32>
    %196 = math.exp %195 : vector<2x32xf32>
    %cst_49 = arith.constant 1.000000e+00 : f32
    %197 = vector.broadcast %cst_49 : f32 to vector<2x32xf32>
    %198 = arith.addf %197, %196 : vector<2x32xf32>
    %199 = arith.divf %197, %198 : vector<2x32xf32>
    %200 = arith.mulf %191, %173 : vector<2x32xf32>
    %201 = arith.mulf %185, %193 : vector<2x32xf32>
    %202 = arith.addf %200, %201 : vector<2x32xf32>
    %203 = math.tanh %202 : vector<2x32xf32>
    %204 = arith.mulf %199, %203 : vector<2x32xf32>
    %c12_50 = arith.constant 12 : index
    %c0_51 = arith.constant 0 : index
    %205 = vector.load %arg5[%c12_50, %c0_51] : memref<16x32xf32, #tpu.memory_space<vmem>>, vector<2x32xf32>
    tpu.vector_store %arg5[%c12_50, %c0_51], %204 {strides = array<i32>} : memref<16x32xf32, #tpu.memory_space<vmem>>, vector<2x32xf32>,
    %c14 = arith.constant 14 : index
    %c0_52 = arith.constant 0 : index
    %206 = vector.load %arg0[%c14, %c0_52] : memref<16x128xf32, #tpu.memory_space<vmem>>, vector<2x128xf32>
    %cst_53 = arith.constant dense<0.000000e+00> : vector<2x128xf32>
    %207 = tpu.matmul %204, %0, %cst_53 {dimension_numbers = #tpu.dot_dimension_numbers<[1], [0], [0], [1], [0, 0, 1, 1], [], []>} : vector<2x32xf32>, vector<32x128xf32>, vector<2x128xf32> -> vector<2x128xf32>
    %208 = arith.addf %206, %207 : vector<2x128xf32>
    %209 = vector.extract_strided_slice %208 {offsets = [0, 0], sizes = [2, 32], strides = [1, 1]} : vector<2x128xf32> to vector<2x32xf32>
    %210 = arith.negf %209 : vector<2x32xf32>
    %211 = math.exp %210 : vector<2x32xf32>
    %cst_54 = arith.constant 1.000000e+00 : f32
    %212 = vector.broadcast %cst_54 : f32 to vector<2x32xf32>
    %213 = arith.addf %212, %211 : vector<2x32xf32>
    %214 = arith.divf %212, %213 : vector<2x32xf32>
    %215 = vector.extract_strided_slice %208 {offsets = [0, 32], sizes = [2, 32], strides = [1, 1]} : vector<2x128xf32> to vector<2x32xf32>
    %216 = arith.negf %215 : vector<2x32xf32>
    %217 = math.exp %216 : vector<2x32xf32>
    %cst_55 = arith.constant 1.000000e+00 : f32
    %218 = vector.broadcast %cst_55 : f32 to vector<2x32xf32>
    %219 = arith.addf %218, %217 : vector<2x32xf32>
    %220 = arith.divf %218, %219 : vector<2x32xf32>
    %221 = vector.extract_strided_slice %208 {offsets = [0, 64], sizes = [2, 32], strides = [1, 1]} : vector<2x128xf32> to vector<2x32xf32>
    %222 = math.tanh %221 : vector<2x32xf32>
    %223 = vector.extract_strided_slice %208 {offsets = [0, 96], sizes = [2, 32], strides = [1, 1]} : vector<2x128xf32> to vector<2x32xf32>
    %224 = arith.negf %223 : vector<2x32xf32>
    %225 = math.exp %224 : vector<2x32xf32>
    %cst_56 = arith.constant 1.000000e+00 : f32
    %226 = vector.broadcast %cst_56 : f32 to vector<2x32xf32>
    %227 = arith.addf %226, %225 : vector<2x32xf32>
    %228 = arith.divf %226, %227 : vector<2x32xf32>
    %229 = arith.mulf %220, %202 : vector<2x32xf32>
    %230 = arith.mulf %214, %222 : vector<2x32xf32>
    %231 = arith.addf %229, %230 : vector<2x32xf32>
    %232 = math.tanh %231 : vector<2x32xf32>
    %233 = arith.mulf %228, %232 : vector<2x32xf32>
    %c14_57 = arith.constant 14 : index
    %c0_58 = arith.constant 0 : index
    %234 = vector.load %arg5[%c14_57, %c0_58] : memref<16x32xf32, #tpu.memory_space<vmem>>, vector<2x32xf32>
    tpu.vector_store %arg5[%c14_57, %c0_58], %233 {strides = array<i32>} : memref<16x32xf32, #tpu.memory_space<vmem>>, vector<2x32xf32>,
    %c0_59 = arith.constant 0 : index
    %c0_60 = arith.constant 0 : index
    %235 = vector.load %arg5[%c0_59, %c0_60] : memref<16x32xf32, #tpu.memory_space<vmem>>, vector<16x32xf32>
    %c0_61 = arith.constant 0 : index
    %c0_62 = arith.constant 0 : index
    %236 = vector.load %arg2[%c0_61, %c0_62] : memref<32x128xf32, #tpu.memory_space<vmem>>, vector<32x128xf32>
    %cst_63 = arith.constant dense<0.000000e+00> : vector<16x128xf32>
    %237 = tpu.matmul %235, %236, %cst_63 {dimension_numbers = #tpu.dot_dimension_numbers<[1], [0], [0], [1], [0, 0, 1, 1], [], []>} : vector<16x32xf32>, vector<32x128xf32>, vector<16x128xf32> -> vector<16x128xf32>
    %c0_64 = arith.constant 0 : index
    %c0_65 = arith.constant 0 : index
    %238 = vector.load %arg3[%c0_64, %c0_65] : memref<1x128xf32, #tpu.memory_space<vmem>>, vector<1x128xf32>
    %239 = vector.broadcast %238 : vector<1x128xf32> to vector<16x128xf32>
    %240 = arith.addf %237, %239 : vector<16x128xf32>
    %c0_66 = arith.constant 0 : index
    %c0_67 = arith.constant 0 : index
    %241 = vector.load %arg4[%c0_66, %c0_67] : memref<16x128xf32, #tpu.memory_space<vmem>>, vector<16x128xf32>
    tpu.vector_store %arg4[%c0_66, %c0_67], %240 {strides = array<i32>} : memref<16x128xf32, #tpu.memory_space<vmem>>, vector<16x128xf32>,
    return
  }
}

</mosaic_0001>

<bundles_post_ra>
// kernel: tpu_custom_call.1
= control target key start
LH: loop header
LB: loop body
LE: loop exit
PB: predicated region body
PF: predicated region fallthrough
CT: control target
= control target key end

     0   :  { %9 = vsyncpa [#allocation4], 0  ;;  %s1600_s0 = inlined_call_operand.hbm [shape: f32[16,128], index: 0, kind: input, shape index: {}]   ;;  %s1601_s1 = inlined_call_operand.hbm [shape: f32[32,128], index: 1, kind: input, shape index: {}]   ;;  %s1602_s2 = inlined_call_operand.hbm [shape: f32[32,128], index: 2, kind: input, shape index: {}]   ;;  %s1603_s3 = inlined_call_operand.vmem [shape: f32[1,128], index: 3, kind: input, shape index: {}]   ;;  %s1604_s4 = inlined_call_operand.hbm [shape: f32[16,128], index: 4, kind: output, shape index: {}]  }
   0x1   :  { %10 = vsyncpa [#allocation7], 0 }
   0x2   :  { %11 = vsyncpa [#allocation5], 0  ;;  %s1392_s15 = smov [#allocation6]   ;;  %s1393_s17 = smov [#allocation3]  }
   0x3   :  { %s29_s16 = sshll.u32 %s1392_s15, 4  ;;  %s17_s18 = sshll.u32 %s1393_s17, 4  ;;  %s30_s16 = int_to_ptr.vmem [resolvable:$true] %s29_s16  ;;  %s1428_s18 = int_to_ptr.vmem [resolvable:$true] %s17_s18 }
   0x4   :  { %s1298_s21 = scalar_lea.hbm %s1601_s1, 512 }
   0x5   :  { %p1299_p0 = scmp.ne.s32.totalorder %s1601_s1, %s1298_s21  ;;  %p1302_p1 = scmp.lt.u32.totalorder %s1298_s21, %s1601_s1 }
   0x7   :  { %p1304_p2 = pnand %p1302_p1, %p1299_p0 }
   0x9   :  { %1307 = shalt.err (!%p1304_p2)
}
   0xa   :  { %s1308_s26 = scalar_lea.vmem %s30_s16, 512  ;;  %p1313_p4 = scmp.lt.s32.totalorder %s30_s16, %s30_s16 }
   0xb   :  { %p1309_p3 = scmp.ne.s32.totalorder %s30_s16, %s1308_s26  ;;  %p1314_p5 = scmp.lt.s32.totalorder %s1308_s26, %s1308_s26 }
   0xd   :  { %p1315_p6 = por %p1314_p5, %p1313_p4 }
   0xf   :  { %p1316_p7 = pnand %p1315_p6, %p1309_p3 }
  0x11   :  { %1319 = shalt.err (!%p1316_p7)
}
  0x12   :  { %s1394_s27 = smov 128   ;;  %s1395_s28 = smov 8  }
  0x13   :  { %35 = dma.hbm_to_vmem [thread:$0]  %s1601_s1, 512, %s30_s16, [#allocation7], %s1394_s27, %s1394_s27, %s1395_s28  }
  0x14   :  { %s1320_s7 = scalar_lea.hbm %s1600_s0, 256 }
  0x15   :  { %p1321_p8 = scmp.ne.s32.totalorder %s1600_s0, %s1320_s7  ;;  %p1324_p9 = scmp.lt.u32.totalorder %s1320_s7, %s1600_s0 }
  0x17   :  { %p1326_p10 = pnand %p1324_p9, %p1321_p8 }
  0x19   :  { %1329 = shalt.err (!%p1326_p10)
}
  0x1a   :  { %s1330_s12 = scalar_lea.vmem %s1428_s18, 256  ;;  %p1335_p12 = scmp.lt.s32.totalorder %s1428_s18, %s1428_s18 }
  0x1b   :  { %p1331_p11 = scmp.ne.s32.totalorder %s1428_s18, %s1330_s12  ;;  %p1336_p13 = scmp.lt.s32.totalorder %s1330_s12, %s1330_s12 }
  0x1d   :  { %p1337_p0 = por %p1336_p13, %p1335_p12 }
  0x1f   :  { %p1338_p1 = pnand %p1337_p0, %p1331_p11 }
  0x21   :  { %1341 = shalt.err (!%p1338_p1)
}
  0x22   :  { %23 = dma.hbm_to_vmem [thread:$0]  %s1600_s0, 256, %s1428_s18, [#allocation4], %s1394_s27, %s1394_s27, %s1395_s28  }
  0x23   :  { %s1396_s14 = smov [#allocation8]   ;;  %s1342_s19 = scalar_lea.hbm %s1602_s2, 512 }
  0x24   :  { %s41_s15 = sshll.u32 %s1396_s14, 4  ;;  %p1343_p2 = scmp.ne.s32.totalorder %s1602_s2, %s1342_s19  ;;  %s42_s15 = int_to_ptr.vmem [resolvable:$true] %s41_s15 }
  0x25   :  { %p1346_p3 = scmp.lt.u32.totalorder %s1342_s19, %s1602_s2 }
  0x27   :  { %p1348_p4 = pnand %p1346_p3, %p1343_p2 }
  0x29   :  { %1351 = shalt.err (!%p1348_p4)
}
  0x2a   :  { %s1352_s24 = scalar_lea.vmem %s42_s15, 512  ;;  %p1357_p6 = scmp.lt.s32.totalorder %s42_s15, %s42_s15 }
  0x2b   :  { %p1353_p5 = scmp.ne.s32.totalorder %s42_s15, %s1352_s24  ;;  %p1358_p7 = scmp.lt.s32.totalorder %s1352_s24, %s1352_s24 }
  0x2d   :  { %p1359_p8 = por %p1358_p7, %p1357_p6 }
  0x2f   :  { %p1360_p9 = pnand %p1359_p8, %p1353_p5 }
  0x31   :  { %1363 = shalt.err (!%p1360_p9)
}
  0x32   :  { %47 = dma.hbm_to_vmem [thread:$0]  %s1602_s2, 512, %s42_s15, [#allocation7], %s1394_s27, %s1394_s27, %s1395_s28  }
  0x33   :  { %1386 = dma.done.wait [#allocation4], 256  }
  0x34   :  { %1387 = vsyncadd [#allocation4], 4294967040 }
  0x35   :  { %1388 = dma.done.wait [#allocation7], 1024  }
  0x36   :  { %1389 = vsyncadd [#allocation7], 4294966272  ;;  %v1397_v0 = vmov 0.0|0.0   ;;  %vm1398_vm0 = vmmov 0   ;;  %v1399_v1 = vmov 0.0   ;;  %v59_v2 = vld [vmem:[#allocation6] sm:$0xff] }
  0x37   :  { %1167 = vmatprep.subr.bf16.mxu0 %v1397_v0  ;;  %1076 = vmatprep.mubr.msk.f32.mxu0 %vm1398_vm0, %v1399_v1  ;;  %v60_v3 = vld [vmem:[#allocation6 + $0x8] sm:$0xff]  ;;  %v61_v4 = vld [vmem:[#allocation6 + $0x10] sm:$0xff]  ;;  %v62_v6 = vld [vmem:[#allocation6 + $0x18] sm:$0xff]  ;;  %s1400_s2 = smov 64   ;;  %s1401_s25 = smov 32   ;;  %vm167_vm1 = vcmask 254976  }
  0x38   :  { %1173 = vmatprep.subr.bf16.mxu1 %v1397_v0  ;;  %1087 = vmatprep.mubr.msk.f32.mxu1 %vm1398_vm0, %v1399_v1  ;;  %v1486_v5 = vpack.c.bf16 %v60_v3, %v59_v2  ;;  %v1489_v7 = vpack.c.bf16 %v62_v6, %v61_v4  ;;  %v63_v8 = vld [vmem:[#allocation3] sm:$0x3]  ;;  %vm64_vm2 = vcmask 261120   ;;  %v169_v26 = vld [vmem:[#allocation3 + $0x2] sm:$0x3]  ;;  %s1402_s30 = smov [#allocation9]  }
  0x39   :  { %v272_v44 = vld [vmem:[#allocation3 + $0x4] sm:$0x3]  ;;  %v375_v62 = vld [vmem:[#allocation3 + $0x6] sm:$0x3]  ;;  %s991_s5 = sshll.u32 %s1402_s30, 4  ;;  %s992_s5 = int_to_ptr.vmem [resolvable:$true] %s991_s5 }
  0x3a   :  { %1169 = vmatpush3.bf16.msra.mxu0 %v1486_v5  ;;  %1175 = vmatpush3.bf16.msra.mxu1 %v1486_v5  ;;  %s1364_s6 = scalar_lea.vmem %s992_s5, 256  ;;  %p1369_p11 = scmp.lt.s32.totalorder %s992_s5, %s992_s5 }
  0x3b   :  { %1170 = vmatprep.subr.bf16.mxu0 %v1397_v0  ;;  %1176 = vmatprep.subr.bf16.mxu1 %v1397_v0  ;;  %p1365_p10 = scmp.ne.s32.totalorder %s992_s5, %s1364_s6  ;;  %p1370_p12 = scmp.lt.s32.totalorder %s1364_s6, %s1364_s6 }
  0x3d   :  { %p1371_p13 = por %p1370_p12, %p1369_p11 }
  0x3e   :  { %1172 = vmatpush3.bf16.msra.mxu0 %v1489_v7  ;;  %1178 = vmatpush3.bf16.msra.mxu1 %v1489_v7 }
  0x3f   :  { %1179 = vmatprep.subr.bf16.mxu0 %v1397_v0  ;;  %1185 = vmatprep.subr.bf16.mxu1 %v1397_v0  ;;  %p1372_p0 = pnand %p1371_p13, %p1365_p10 }
  0x41   :  { %1077 = vmatmul.mubr.f32.vlgmr.msra.gmra.mrb[0].mxu0 %v1399_v1 }
  0x42   :  { %1181 = vmatpush3.bf16.msra.mxu0 %v1486_v5  ;;  %1098 = vmatprep.mubr.msk.f32.mxu0 %vm1398_vm0, %v1399_v1 }
  0x43   :  { %1182 = vmatprep.subr.bf16.mxu0 %v1397_v0 }
  0x46   :  { %1184 = vmatpush3.bf16.msra.mxu0 %v1489_v7 }
  0x47   :  { %1191 = vmatprep.subr.bf16.mxu0 %v1397_v0 }
 0x114   :  { %v134_v9 = vpop.f32.mrb[0].mxu0 }
 0x115   :  { %v138_v10 = vadd.f32 %v134_v9, %v63_v8  ;;  %v1078_v11 = vpop.f32.mrb[1].mxu0 }
 0x117   :  { %1234 = vtanh.f32 %v138_v10  ;;  %v1004_v13 = vmul.f32 -1.442695, %v138_v10 }
 0x119   :  { %1236 = vpow2.f32 %v1004_v13 }
 0x121   :  { %v1235_v12 = vpop.eup %1234 }
 0x122   :  { %148 = vrot.lane.b32.xlu0 %v1235_v12, %s1400_s2 }
 0x123   :  { %v1237_v14 = vpop.eup %1236 }
 0x124   :  { %v142_v15 = vadd.f32 1.0, %v1237_v14 }
 0x126   :  { %1238 = vrcp.f32 %v142_v15 }
 0x130   :  { %v1239_v16 = vpop.eup %1238 }
 0x131   :  { %v146_v19 = vmul.f32 0.0, %v1239_v16 }
 0x194   :  { %v149_v17 = vpop.permute.xlu0 %148 }
 0x195   :  { %v151_v18 = vmul.f32 %v1239_v16, %v149_v17 }
 0x197   :  { %153 = vrot.lane.b32.xlu0 %v151_v18, %s1401_s25 }
 0x209   :  { %v154_v20 = vpop.permute.xlu0 %153 }
 0x20a   :  { %v156_v21 = vadd.f32 %v154_v20, %v146_v19  ;;  %v478_v20 = vld [vmem:[#allocation3 + $0x8] sm:$0x3] }
 0x20c   :  { %1240 = vtanh.f32 %v156_v21 }
 0x216   :  { %v1241_v22 = vpop.eup %1240 }
 0x217   :  { %159 = vrot.lane.b32.xlu1 %v1241_v22, %s1400_s2 }
 0x289   :  { %v160_v23 = vpop.permute.xlu1 %159 }
 0x28a   :  { %v162_v24 = vmul.f32 %v1239_v16, %v160_v23 }
 0x28c   :  { %164 = vrot.lane.b32.xlu1 %v162_v24, %s1401_s25 }
 0x2fe   :  { %v165_v25 = vpop.permute.xlu1 %164 }
 0x2ff   :  { %168 = vst.msk [vmem:[#allocation2] sm:$0x3] %vm167_vm1, %v165_v25  ;;  %1088 = vmatmul.mubr.msk.f32.vlgmr.msra.gmra.mrb[0].mxu1 %vm64_vm2, %v165_v25 }
 0x300   :  { %1187 = vmatpush3.bf16.msra.mxu1 %v1486_v5  ;;  %1109 = vmatprep.mubr.msk.f32.mxu1 %vm1398_vm0, %v1399_v1 }
 0x301   :  { %1188 = vmatprep.subr.bf16.mxu1 %v1397_v0 }
 0x304   :  { %1190 = vmatpush3.bf16.msra.mxu1 %v1489_v7 }
 0x305   :  { %1197 = vmatprep.subr.bf16.mxu1 %v1397_v0 }
 0x3d2   :  { %v238_v27 = vpop.f32.mrb[0].mxu1 }
 0x3d3   :  { %v242_v28 = vadd.f32 %v238_v27, %v169_v26  ;;  %v1089_v29 = vpop.f32.mrb[1].mxu1 }
 0x3d5   :  { %1242 = vtanh.f32 %v242_v28  ;;  %v1006_v31 = vmul.f32 -1.442695, %v242_v28 }
 0x3d7   :  { %1244 = vpow2.f32 %v1006_v31 }
 0x3df   :  { %v1243_v30 = vpop.eup %1242 }
 0x3e0   :  { %252 = vrot.lane.b32.xlu0 %v1243_v30, %s1400_s2 }
 0x3e1   :  { %v1245_v32 = vpop.eup %1244 }
 0x3e2   :  { %v246_v33 = vadd.f32 1.0, %v1245_v32 }
 0x3e4   :  { %1246 = vrcp.f32 %v246_v33 }
 0x3ee   :  { %v1247_v34 = vpop.eup %1246 }
 0x3ef   :  { %v250_v37 = vmul.f32 %v1247_v34, %v156_v21 }
 0x452   :  { %v253_v35 = vpop.permute.xlu0 %252 }
 0x453   :  { %v255_v36 = vmul.f32 %v1247_v34, %v253_v35 }
 0x455   :  { %257 = vrot.lane.b32.xlu1 %v255_v36, %s1401_s25 }
 0x4c7   :  { %v258_v38 = vpop.permute.xlu1 %257 }
 0x4c8   :  { %v260_v39 = vadd.f32 %v258_v38, %v250_v37  ;;  %v581_v38 = vld [vmem:[#allocation3 + $0xa] sm:$0x3] }
 0x4ca   :  { %1248 = vtanh.f32 %v260_v39 }
 0x4d4   :  { %v1249_v40 = vpop.eup %1248 }
 0x4d5   :  { %263 = vrot.lane.b32.xlu0 %v1249_v40, %s1400_s2 }
 0x547   :  { %v264_v41 = vpop.permute.xlu0 %263 }
 0x548   :  { %v266_v42 = vmul.f32 %v1247_v34, %v264_v41 }
 0x54a   :  { %268 = vrot.lane.b32.xlu1 %v266_v42, %s1401_s25 }
 0x5bc   :  { %v269_v43 = vpop.permute.xlu1 %268 }
 0x5bd   :  { %271 = vst.msk [vmem:[#allocation2 + $0x2] sm:$0x3] %vm167_vm1, %v269_v43  ;;  %1099 = vmatmul.mubr.msk.f32.vlgmr.msra.gmra.mrb[2].mxu0 %vm64_vm2, %v269_v43 }
 0x5be   :  { %1193 = vmatpush3.bf16.msra.mxu0 %v1486_v5  ;;  %1120 = vmatprep.mubr.msk.f32.mxu0 %vm1398_vm0, %v1399_v1 }
 0x5bf   :  { %1194 = vmatprep.subr.bf16.mxu0 %v1397_v0 }
 0x5c2   :  { %1196 = vmatpush3.bf16.msra.mxu0 %v1489_v7 }
 0x5c3   :  { %1203 = vmatprep.subr.bf16.mxu0 %v1397_v0 }
 0x690   :  { %v341_v45 = vpop.f32.mrb[2].mxu0 }
 0x691   :  { %v345_v46 = vadd.f32 %v341_v45, %v272_v44  ;;  %v1100_v47 = vpop.f32.mrb[3].mxu0 }
 0x693   :  { %1250 = vtanh.f32 %v345_v46  ;;  %v1008_v49 = vmul.f32 -1.442695, %v345_v46 }
 0x695   :  { %1252 = vpow2.f32 %v1008_v49 }
 0x69d   :  { %v1251_v48 = vpop.eup %1250 }
 0x69e   :  { %355 = vrot.lane.b32.xlu0 %v1251_v48, %s1400_s2 }
 0x69f   :  { %v1253_v50 = vpop.eup %1252 }
 0x6a0   :  { %v349_v51 = vadd.f32 1.0, %v1253_v50 }
 0x6a2   :  { %1254 = vrcp.f32 %v349_v51 }
 0x6ac   :  { %v1255_v52 = vpop.eup %1254 }
 0x6ad   :  { %v353_v55 = vmul.f32 %v1255_v52, %v260_v39 }
 0x710   :  { %v356_v53 = vpop.permute.xlu0 %355 }
 0x711   :  { %v358_v54 = vmul.f32 %v1255_v52, %v356_v53  ;;  %v684_v53 = vld [vmem:[#allocation3 + $0xc] sm:$0x3] }
 0x713   :  { %360 = vrot.lane.b32.xlu1 %v358_v54, %s1401_s25 }
 0x785   :  { %v361_v56 = vpop.permute.xlu1 %360 }
 0x786   :  { %v363_v57 = vadd.f32 %v361_v56, %v353_v55 }
 0x788   :  { %1256 = vtanh.f32 %v363_v57 }
 0x792   :  { %v1257_v58 = vpop.eup %1256 }
 0x793   :  { %366 = vrot.lane.b32.xlu0 %v1257_v58, %s1400_s2 }
 0x805   :  { %v367_v59 = vpop.permute.xlu0 %366 }
 0x806   :  { %v369_v60 = vmul.f32 %v1255_v52, %v367_v59 }
 0x808   :  { %371 = vrot.lane.b32.xlu1 %v369_v60, %s1401_s25 }
 0x87a   :  { %v372_v61 = vpop.permute.xlu1 %371 }
 0x87b   :  { %374 = vst.msk [vmem:[#allocation2 + $0x4] sm:$0x3] %vm167_vm1, %v372_v61  ;;  %1110 = vmatmul.mubr.msk.f32.vlgmr.msra.gmra.mrb[2].mxu1 %vm64_vm2, %v372_v61 }
 0x87c   :  { %1199 = vmatpush3.bf16.msra.mxu1 %v1486_v5  ;;  %1131 = vmatprep.mubr.msk.f32.mxu1 %vm1398_vm0, %v1399_v1 }
 0x87d   :  { %1200 = vmatprep.subr.bf16.mxu1 %v1397_v0 }
 0x880   :  { %1202 = vmatpush3.bf16.msra.mxu1 %v1489_v7 }
 0x881   :  { %1209 = vmatprep.subr.bf16.mxu1 %v1397_v0 }
 0x94e   :  { %v444_v63 = vpop.f32.mrb[2].mxu1 }
 0x94f   :  { %v448_v2 = vadd.f32 %v444_v63, %v375_v62  ;;  %v1111_v3 = vpop.f32.mrb[3].mxu1 }
 0x951   :  { %1258 = vtanh.f32 %v448_v2  ;;  %v1010_v6 = vmul.f32 -1.442695, %v448_v2 }
 0x953   :  { %1260 = vpow2.f32 %v1010_v6 }
 0x95b   :  { %v1259_v4 = vpop.eup %1258 }
 0x95c   :  { %458 = vrot.lane.b32.xlu0 %v1259_v4, %s1400_s2 }
 0x95d   :  { %v1261_v8 = vpop.eup %1260 }
 0x95e   :  { %v452_v9 = vadd.f32 1.0, %v1261_v8 }
 0x960   :  { %1262 = vrcp.f32 %v452_v9 }
 0x96a   :  { %v1263_v10 = vpop.eup %1262 }
 0x96b   :  { %v456_v13 = vmul.f32 %v1263_v10, %v363_v57 }
 0x9ce   :  { %v459_v11 = vpop.permute.xlu0 %458 }
 0x9cf   :  { %v461_v12 = vmul.f32 %v1263_v10, %v459_v11  ;;  %v787_v11 = vld [vmem:[#allocation3 + $0xe] sm:$0x3] }
 0x9d1   :  { %463 = vrot.lane.b32.xlu1 %v461_v12, %s1401_s25 }
 0xa43   :  { %v464_v14 = vpop.permute.xlu1 %463 }
 0xa44   :  { %v466_v15 = vadd.f32 %v464_v14, %v456_v13 }
 0xa46   :  { %1264 = vtanh.f32 %v466_v15 }
 0xa50   :  { %v1265_v16 = vpop.eup %1264 }
 0xa51   :  { %469 = vrot.lane.b32.xlu0 %v1265_v16, %s1400_s2 }
 0xac3   :  { %v470_v17 = vpop.permute.xlu0 %469 }
 0xac4   :  { %v472_v18 = vmul.f32 %v1263_v10, %v470_v17 }
 0xac6   :  { %474 = vrot.lane.b32.xlu1 %v472_v18, %s1401_s25 }
 0xb38   :  { %v475_v19 = vpop.permute.xlu1 %474 }
 0xb39   :  { %477 = vst.msk [vmem:[#allocation2 + $0x6] sm:$0x3] %vm167_vm1, %v475_v19  ;;  %1121 = vmatmul.mubr.msk.f32.vlgmr.msra.gmra.mrb[4].mxu0 %vm64_vm2, %v475_v19 }
 0xb3a   :  { %1205 = vmatpush3.bf16.msra.mxu0 %v1486_v5  ;;  %1142 = vmatprep.mubr.msk.f32.mxu0 %vm1398_vm0, %v1399_v1 }
 0xb3b   :  { %1206 = vmatprep.subr.bf16.mxu0 %v1397_v0 }
 0xb3e   :  { %1208 = vmatpush3.bf16.msra.mxu0 %v1489_v7 }
 0xb40   :  { %v890_v52 = vld [vmem:[#allocation2] sm:$0xff] }
 0xc0c   :  { %v547_v21 = vpop.f32.mrb[4].mxu0 }
 0xc0d   :  { %v551_v22 = vadd.f32 %v547_v21, %v478_v20  ;;  %v1122_v23 = vpop.f32.mrb[5].mxu0 }
 0xc0f   :  { %1266 = vtanh.f32 %v551_v22  ;;  %v1012_v25 = vmul.f32 -1.442695, %v551_v22 }
 0xc11   :  { %1268 = vpow2.f32 %v1012_v25 }
 0xc19   :  { %v1267_v24 = vpop.eup %1266 }
 0xc1a   :  { %561 = vrot.lane.b32.xlu0 %v1267_v24, %s1400_s2 }
 0xc1b   :  { %v1269_v26 = vpop.eup %1268 }
 0xc1c   :  { %v555_v27 = vadd.f32 1.0, %v1269_v26  ;;  %v892_v26 = vld [vmem:[#allocation8] sm:$0xff] }
 0xc1e   :  { %1270 = vrcp.f32 %v555_v27  ;;  %v893_v27 = vld [vmem:[#allocation8 + $0x8] sm:$0xff] }
 0xc28   :  { %v1271_v28 = vpop.eup %1270 }
 0xc29   :  { %v559_v31 = vmul.f32 %v1271_v28, %v466_v15 }
 0xc8c   :  { %v562_v29 = vpop.permute.xlu0 %561 }
 0xc8d   :  { %v564_v30 = vmul.f32 %v1271_v28, %v562_v29  ;;  %v894_v29 = vld [vmem:[#allocation8 + $0x10] sm:$0xff] }
 0xc8f   :  { %566 = vrot.lane.b32.xlu1 %v564_v30, %s1401_s25  ;;  %v895_v30 = vld [vmem:[#allocation8 + $0x18] sm:$0xff] }
 0xd01   :  { %v567_v32 = vpop.permute.xlu1 %566 }
 0xd02   :  { %v569_v33 = vadd.f32 %v567_v32, %v559_v31  ;;  %v1219_v31 = vpack.c.bf16 %v895_v30, %v894_v29 }
 0xd04   :  { %1272 = vtanh.f32 %v569_v33 }
 0xd0e   :  { %v1273_v34 = vpop.eup %1272 }
 0xd0f   :  { %572 = vrot.lane.b32.xlu0 %v1273_v34, %s1400_s2 }
 0xd81   :  { %v573_v35 = vpop.permute.xlu0 %572 }
 0xd82   :  { %v575_v36 = vmul.f32 %v1271_v28, %v573_v35  ;;  %v1215_v28 = vpack.c.bf16 %v893_v27, %v892_v26 }
 0xd84   :  { %577 = vrot.lane.b32.xlu1 %v575_v36, %s1401_s25  ;;  %1216 = vmatprep.subr.bf16.mxu0 %v1215_v28  ;;  %v1019_v36 = vld [vmem:[%s1603_s3] ss:$0 sm:$0xff] }
 0xdf6   :  { %v578_v37 = vpop.permute.xlu1 %577 }
 0xdf7   :  { %580 = vst.msk [vmem:[#allocation2 + $0x8] sm:$0x3] %vm167_vm1, %v578_v37  ;;  %1132 = vmatmul.mubr.msk.f32.vlgmr.msra.gmra.mrb[4].mxu1 %vm64_vm2, %v578_v37 }
 0xdf8   :  { %1211 = vmatpush3.bf16.msra.mxu1 %v1486_v5  ;;  %1153 = vmatprep.mubr.msk.f32.mxu1 %vm1398_vm0, %v1399_v1 }
 0xdf9   :  { %1212 = vmatprep.subr.bf16.mxu1 %v1397_v0 }
 0xdfc   :  { %1214 = vmatpush3.bf16.msra.mxu1 %v1489_v7 }
 0xeca   :  { %v650_v39 = vpop.f32.mrb[4].mxu1 }
 0xecb   :  { %v654_v40 = vadd.f32 %v650_v39, %v581_v38  ;;  %v1133_v41 = vpop.f32.mrb[5].mxu1 }
 0xecd   :  { %1274 = vtanh.f32 %v654_v40  ;;  %v1014_v43 = vmul.f32 -1.442695, %v654_v40 }
 0xecf   :  { %1276 = vpow2.f32 %v1014_v43 }
 0xed7   :  { %v1275_v42 = vpop.eup %1274 }
 0xed8   :  { %664 = vrot.lane.b32.xlu0 %v1275_v42, %s1400_s2 }
 0xed9   :  { %v1277_v44 = vpop.eup %1276 }
 0xeda   :  { %v658_v45 = vadd.f32 1.0, %v1277_v44 }
 0xedc   :  { %1278 = vrcp.f32 %v658_v45 }
 0xee6   :  { %v1279_v5 = vpop.eup %1278 }
 0xee7   :  { %v662_v0 = vmul.f32 %v1279_v5, %v569_v33 }
 0xf4a   :  { %v665_v46 = vpop.permute.xlu0 %664 }
 0xf4b   :  { %v667_v1 = vmul.f32 %v1279_v5, %v665_v46 }
 0xf4d   :  { %669 = vrot.lane.b32.xlu1 %v667_v1, %s1401_s25 }
 0xfbf   :  { %v670_v7 = vpop.permute.xlu1 %669 }
 0xfc0   :  { %v672_v47 = vadd.f32 %v670_v7, %v662_v0 }
 0xfc2   :  { %1280 = vtanh.f32 %v672_v47 }
 0xfcc   :  { %v1281_v48 = vpop.eup %1280 }
 0xfcd   :  { %675 = vrot.lane.b32.xlu0 %v1281_v48, %s1400_s2 }
0x103f   :  { %v676_v49 = vpop.permute.xlu0 %675 }
0x1040   :  { %v678_v50 = vmul.f32 %v1279_v5, %v676_v49 }
0x1042   :  { %680 = vrot.lane.b32.xlu1 %v678_v50, %s1401_s25 }
0x10b4   :  { %v681_v51 = vpop.permute.xlu1 %680 }
0x10b5   :  { %683 = vst.msk [vmem:[#allocation2 + $0xa] sm:$0x3] %vm167_vm1, %v681_v51  ;;  %1143 = vmatmul.mubr.msk.f32.vlgmr.msra.gmra.mrb[6].mxu0 %vm64_vm2, %v681_v51 }
0x10b6   :  { %1164 = vmatprep.mubr.msk.f32.mxu0 %vm64_vm2, %v890_v52  ;;  %1218 = vmatpush3.bf16.msra.mxu0 %v1215_v28 }
0x10b7   :  { %1220 = vmatprep.subr.bf16.mxu0 %v1219_v31 }
0x10ba   :  { %1222 = vmatpush3.bf16.msra.mxu0 %v1219_v31 }
0x1188   :  { %v753_v54 = vpop.f32.mrb[6].mxu0 }
0x1189   :  { %v757_v55 = vadd.f32 %v753_v54, %v684_v53  ;;  %v1144_v56 = vpop.f32.mrb[7].mxu0 }
0x118b   :  { %1282 = vtanh.f32 %v757_v55  ;;  %v1016_v58 = vmul.f32 -1.442695, %v757_v55 }
0x118d   :  { %1284 = vpow2.f32 %v1016_v58 }
0x1195   :  { %v1283_v57 = vpop.eup %1282 }
0x1196   :  { %767 = vrot.lane.b32.xlu0 %v1283_v57, %s1400_s2 }
0x1197   :  { %v1285_v59 = vpop.eup %1284 }
0x1198   :  { %v761_v60 = vadd.f32 1.0, %v1285_v59 }
0x119a   :  { %1286 = vrcp.f32 %v761_v60 }
0x11a4   :  { %v1287_v61 = vpop.eup %1286 }
0x11a5   :  { %v765_v2 = vmul.f32 %v1287_v61, %v672_v47 }
0x1208   :  { %v768_v62 = vpop.permute.xlu0 %767 }
0x1209   :  { %v770_v63 = vmul.f32 %v1287_v61, %v768_v62 }
0x120b   :  { %772 = vrot.lane.b32.xlu1 %v770_v63, %s1401_s25 }
0x127d   :  { %v773_v3 = vpop.permute.xlu1 %772 }
0x127e   :  { %v775_v4 = vadd.f32 %v773_v3, %v765_v2 }
0x1280   :  { %1288 = vtanh.f32 %v775_v4 }
0x128a   :  { %v1289_v6 = vpop.eup %1288 }
0x128b   :  { %778 = vrot.lane.b32.xlu0 %v1289_v6, %s1400_s2 }
0x12fd   :  { %v779_v8 = vpop.permute.xlu0 %778 }
0x12fe   :  { %v781_v9 = vmul.f32 %v1287_v61, %v779_v8 }
0x1300   :  { %783 = vrot.lane.b32.xlu1 %v781_v9, %s1401_s25 }
0x1372   :  { %v784_v10 = vpop.permute.xlu1 %783 }
0x1373   :  { %786 = vst.msk [vmem:[#allocation2 + $0xc] sm:$0x3] %vm167_vm1, %v784_v10  ;;  %1154 = vmatmul.mubr.msk.f32.vlgmr.msra.gmra.mrb[6].mxu1 %vm64_vm2, %v784_v10 }
0x1446   :  { %v856_v12 = vpop.f32.mrb[6].mxu1 }
0x1447   :  { %v860_v13 = vadd.f32 %v856_v12, %v787_v11  ;;  %v1155_v14 = vpop.f32.mrb[7].mxu1 }
0x1449   :  { %1290 = vtanh.f32 %v860_v13  ;;  %v1018_v16 = vmul.f32 -1.442695, %v860_v13 }
0x144b   :  { %1292 = vpow2.f32 %v1018_v16 }
0x1453   :  { %v1291_v15 = vpop.eup %1290 }
0x1454   :  { %870 = vrot.lane.b32.xlu0 %v1291_v15, %s1400_s2 }
0x1455   :  { %v1293_v17 = vpop.eup %1292 }
0x1456   :  { %v864_v18 = vadd.f32 1.0, %v1293_v17 }
0x1458   :  { %1294 = vrcp.f32 %v864_v18 }
0x1462   :  { %v1295_v19 = vpop.eup %1294 }
0x1463   :  { %v868_v22 = vmul.f32 %v1295_v19, %v775_v4 }
0x14c6   :  { %v871_v20 = vpop.permute.xlu0 %870 }
0x14c7   :  { %v873_v21 = vmul.f32 %v1295_v19, %v871_v20 }
0x14c9   :  { %875 = vrot.lane.b32.xlu1 %v873_v21, %s1401_s25 }
0x153b   :  { %v876_v23 = vpop.permute.xlu1 %875 }
0x153c   :  { %v878_v24 = vadd.f32 %v876_v23, %v868_v22 }
0x153e   :  { %1296 = vtanh.f32 %v878_v24 }
0x1548   :  { %v1297_v25 = vpop.eup %1296 }
0x1549   :  { %881 = vrot.lane.b32.xlu0 %v1297_v25, %s1400_s2 }
0x15bb   :  { %v882_v32 = vpop.permute.xlu0 %881 }
0x15bc   :  { %v884_v33 = vmul.f32 %v1295_v19, %v882_v32 }
0x15be   :  { %886 = vrot.lane.b32.xlu1 %v884_v33, %s1401_s25 }
0x1630   :  { %v887_v34 = vpop.permute.xlu1 %886 }
0x1631   :  { %889 = vst.msk [vmem:[#allocation2 + $0xe] sm:$0x3] %vm167_vm1, %v887_v34 }
0x1638   :  { %v891_v35 = vld [vmem:[#allocation2 + $0x8] sm:$0xff] }
0x1639   :  { %1165 = vmatmul.mubr.msk.f32.vlgmr.msra.gmra.mrb[8].mxu0 %vm64_vm2, %v891_v35 }
0x170c   :  { %v1166_v37 = vpop.f32.mrb[8].mxu0 }
0x170d   :  { %v981_v38 = vadd.f32 %v1166_v37, %v1019_v36  ;;  %v975_v39 = vpop.f32.mrb[9].mxu0 }
0x170e   :  { %v976_v40 = vadd.f32 %v1019_v36, %v975_v39 }
0x170f   :  { %985 = vst [vmem:[#allocation9 + $0x8] sm:$0xff] %v981_v38 }
0x1710   :  { %984 = vst [vmem:[#allocation9] sm:$0xff] %v976_v40 }
0x1711   :  { %1375 = shalt.err (!%p1372_p0)
}
0x1712   :  { %s1376_s3 = scalar_lea.hbm %s1604_s4, 256 }
0x1713   :  { %p1377_p1 = scmp.ne.s32.totalorder %s1604_s4, %s1376_s3  ;;  %p1380_p2 = scmp.lt.u32.totalorder %s1376_s3, %s1604_s4 }
0x1715   :  { %p1382_p3 = pnand %p1380_p2, %p1377_p1 }
0x1717   :  { %1385 = shalt.err (!%p1382_p3)
}
0x1718   :  { %997 = dma.vmem_to_hbm [thread:$0]  %s992_s5, 256, %s1604_s4, [#allocation5], %s1394_s27, %s1394_s27, %s1395_s28  }
0x1719   :  { %1390 = dma.done.wait [#allocation5], 256  }
0x171a   :  { %1391 = vsyncadd [#allocation5], 4294967040 }
0x171b   :  { %1001 = vsyncpa [#allocation4], 1 }
0x171c   :  { %1002 = vsyncpa [#allocation7], 1 }
0x171d   :  { %1003 = vsyncpa [#allocation5], 1 }

</bundles_post_ra>
